<compile_context>
chip_gen: v5e
topology: v5e:2x2
jax: 0.10.0
libtpu: 0.0.40
codegen_flags: <defaults>
</compile_context>

<pallas_src>
import functools

import jax
import jax.numpy as jnp
from jax.experimental import pallas as pl
from jax.experimental.pallas import tpu as pltpu

LANE = 128   # lane width used for hidden / output feature padding

# Single-block batch ceiling: ~1.7-2.3 KB live f32/bf16 per row; keep well
# inside v7x's 32 MiB scoped-VMEM default.  Larger batches need a batch grid.
MAX_SINGLE_BLOCK_BATCH = 4096


def _pad_to(n, m):
    return ((n + m - 1) // m) * m


# --------------------------------------------------------------------------
# Kernel
# --------------------------------------------------------------------------
def batch_net_kernel(x_ref,
                     w1_ref, g1_ref, be1_ref,
                     w2_ref, g2_ref, be2_ref,
                     w3_ref, b3_ref,
                     o_ref,
                     *, n_valid):
    eps = jnp.float32(1e-5)
    inv_n = jnp.float32(1.0 / n_valid)

    def bn_relu(h, g, be):
        # One-pass full-batch stats (biased variance, torch training-mode BN),
        # f32 accumulation.  x arrives unpadded, so every row is a real sample.
        s = jnp.sum(h, axis=0, keepdims=True)
        ss = jnp.sum(h * h, axis=0, keepdims=True)
        mu = s * inv_n
        var = jnp.maximum(ss * inv_n - mu * mu, 0.0)
        # Fold BN + affine into one per-feature scale/shift (O(F) row math,
        # rsqrt on the EUP).  Per-element cost: 1 mul + 1 add + 1 max.
        scale = g * jax.lax.rsqrt(var + eps)          # (1, F)
        shift = be - mu * scale                       # (1, F)
        return jnp.maximum(h * scale + shift, 0.0)

    # Cast x to bf16 in-kernel (no wrapper pad/cast HBM round trip).
    x = x_ref[...].astype(jnp.bfloat16)

    # ---- layer1: Linear (bias dropped: cancelled by BN) -> BN -> ReLU ------
    h1 = jnp.dot(x, w1_ref[...], preferred_element_type=jnp.float32)
    h1 = bn_relu(h1, g1_ref[...], be1_ref[...])

    # ---- layer2: Linear (bias dropped) -> BN -> ReLU ------------------------
    h2 = jnp.dot(h1.astype(jnp.bfloat16), w2_ref[...],
                 preferred_element_type=jnp.float32)
    h2 = bn_relu(h2, g2_ref[...], be2_ref[...])

    # ---- layer3: Linear (bias kept) -----------------------------------------
    out = jnp.dot(h2.astype(jnp.bfloat16), w3_ref[...],
                  preferred_element_type=jnp.float32) + b3_ref[...]
    o_ref[...] = out.astype(o_ref.dtype)


# --------------------------------------------------------------------------
# One-time parameter preparation (NOT in the per-call hot path)
# --------------------------------------------------------------------------
def prepare_params(params):
    """Transpose Linear weights (out,in)->(in,out), zero-pad hidden/output
    feature dims to 128 lanes, cast matmul operands to bf16.  b1/b2 are
    intentionally dropped (cancelled by BatchNorm).  BN params stay f32 as
    lane-major (1, F) rows.  w1 keeps in_dim rows (x is passed unpadded)."""
    def pad_mat(a, rows, cols):
        return jnp.pad(a, ((0, rows - a.shape[0]), (0, cols - a.shape[1])))

    def pad_vec(v, cols):
        return jnp.pad(v, (0, cols - v.shape[0]))[None, :].astype(jnp.float32)

    in_dim, h1 = params["w1"].shape[1], params["w1"].shape[0]
    h2, out_dim = params["w2"].shape[0], params["w3"].shape[0]
    h1_p, h2_p, out_p = _pad_to(h1, LANE), _pad_to(h2, LANE), _pad_to(out_dim, LANE)

    return dict(
        in_dim=in_dim, out_dim=out_dim,
        h1_p=h1_p, h2_p=h2_p, out_p=out_p,
        w1=pad_mat(params["w1"].T, in_dim, h1_p).astype(jnp.bfloat16),
        g1=pad_vec(params["g1"], h1_p),
        be1=pad_vec(params["be1"], h1_p),
        w2=pad_mat(params["w2"].T, h1_p, h2_p).astype(jnp.bfloat16),
        g2=pad_vec(params["g2"], h2_p),
        be2=pad_vec(params["be2"], h2_p),
        w3=pad_mat(params["w3"].T, h2_p, out_p).astype(jnp.bfloat16),
        b3=pad_vec(params["b3"], out_p),
    )


# --------------------------------------------------------------------------
# Forward wrapper
# --------------------------------------------------------------------------
def batch_net_forward(x, prep):
    """x: (batch, in_dim) f32, unpadded.  prep: output of prepare_params()."""
    batch, in_dim = x.shape
    assert in_dim == prep["in_dim"]
    assert batch >= 2, "BatchNorm1d training-mode stats need batch >= 2"
    assert batch <= MAX_SINGLE_BLOCK_BATCH, (
        "single-block kernel: larger batches need a batch grid + two-pass BN")

    args = (x,
            prep["w1"], prep["g1"], prep["be1"],
            prep["w2"], prep["g2"], prep["be2"],
            prep["w3"], prep["b3"])

    vmem = pl.BlockSpec(memory_space=pltpu.MemorySpace.VMEM)

    flops = 2 * batch * (in_dim * prep["h1_p"]
                         + prep["h1_p"] * prep["h2_p"]
                         + prep["h2_p"] * prep["out_p"])
    bytes_accessed = (
        x.size * 4
        + sum(prep[k].size * 2 for k in ("w1", "w2", "w3"))
        + sum(prep[k].size * 4 for k in ("g1", "be1", "g2", "be2", "b3"))
        + batch * prep["out_p"] * 4)

    kernel = functools.partial(batch_net_kernel, n_valid=batch)

    out = pl.pallas_call(
        kernel,
        out_shape=jax.ShapeDtypeStruct((batch, prep["out_p"]), jnp.float32),
        in_specs=[vmem] * len(args),
        out_specs=vmem,
        compiler_params=pltpu.CompilerParams(
            # Raises v5e's 16 MiB scoped default; matches v6e/v7x defaults.
            vmem_limit_bytes=32 * 1024 * 1024),
        cost_estimate=pl.CostEstimate(
            flops=flops,
            transcendentals=prep["h1_p"] + prep["h2_p"],  # rsqrt per feature
            bytes_accessed=bytes_accessed),
    )(*args)

    # Strip lane padding (cheap slice of a lane-dense slab).
    return out[:, :prep["out_dim"]]


# --------------------------------------------------------------------------
# Parameter init (PyTorch-shaped) and reference
# --------------------------------------------------------------------------
def init_params(key, in_dim, n_hidden_1, n_hidden_2, out_dim):
    ks = jax.random.split(key, 10)

    def lin(kw, kb, fan_in, fan_out):
        bound = 1.0 / jnp.sqrt(fan_in)
        w = jax.random.uniform(kw, (fan_out, fan_in), jnp.float32, -bound, bound)
        b = jax.random.uniform(kb, (fan_out,), jnp.float32, -bound, bound)
        return w, b

    w1, b1 = lin(ks[0], ks[1], in_dim, n_hidden_1)
    w2, b2 = lin(ks[2], ks[3], n_hidden_1, n_hidden_2)
    w3, b3 = lin(ks[4], ks[5], n_hidden_2, out_dim)
    g1 = 1.0 + 0.1 * jax.random.normal(ks[6], (n_hidden_1,), jnp.float32)
    be1 = 0.1 * jax.random.normal(ks[7], (n_hidden_1,), jnp.float32)
    g2 = 1.0 + 0.1 * jax.random.normal(ks[8], (n_hidden_2,), jnp.float32)
    be2 = 0.1 * jax.random.normal(ks[9], (n_hidden_2,), jnp.float32)
    return dict(w1=w1, b1=b1, g1=g1, be1=be1,
                w2=w2, b2=b2, g2=g2, be2=be2,
                w3=w3, b3=b3)


def reference_forward(x, p):
    """Pure-JAX reference with full PyTorch semantics (Linear biases INCLUDED,
    centered two-pass BN, training mode, eps=1e-5).  MXU operands bf16 with
    f32 accumulation to mirror kernel matmul numerics.  The kernel drops b1/b2
    (cancelled by BN) — this reference confirms that equivalence."""
    eps = 1e-5

    def dot_bf16(a, w_t):
        return jnp.dot(a.astype(jnp.bfloat16), w_t.astype(jnp.bfloat16),
                       preferred_element_type=jnp.float32)

    def bn_relu(h, g, be):
        mu = h.mean(0, keepdims=True)
        var = ((h - mu) ** 2).mean(0, keepdims=True)
        return jnp.maximum((h - mu) / jnp.sqrt(var + eps) * g + be, 0.0)

    h = bn_relu(dot_bf16(x, p["w1"].T) + p["b1"], p["g1"], p["be1"])
    h = bn_relu(dot_bf16(h, p["w2"].T) + p["b2"], p["g2"], p["be2"])
    return dot_bf16(h, p["w3"].T) + p["b3"]


if __name__ == "__main__":
    key = jax.random.PRNGKey(0)
    k_x, k_p = jax.random.split(key)

    batch, in_dim, n_hidden_1, n_hidden_2, out_dim = 8, 32, 64, 64, 16
    x = jax.random.normal(k_x, (batch, in_dim), jnp.float32)
    params = init_params(k_p, in_dim, n_hidden_1, n_hidden_2, out_dim)

    prep = prepare_params(params)  # one-time: transpose / pad / bf16-cast

    out = jax.block_until_ready(batch_net_forward(x, prep))
    ref = reference_forward(x, params)

    assert out.shape == (batch, out_dim)
    # Tolerance reflects bf16 MXU operands (shared by kernel and reference)
    # plus tiny divergence from the one-pass variance / folded-BN rounding.
    assert jnp.allclose(out, ref, atol=1e-2, rtol=1e-2), "mismatch vs reference"
    print("KERNEL_OK")
</pallas_src>

<mosaic_0001>
module attributes {stable_mosaic.version = 11 : i64} {
  func.func @batch_net_kernel(%arg0: memref<8x32xf32, #tpu.memory_space<vmem>>, %arg1: memref<32x128xbf16, #tpu.memory_space<vmem>>, %arg2: memref<1x128xf32, #tpu.memory_space<vmem>>, %arg3: memref<1x128xf32, #tpu.memory_space<vmem>>, %arg4: memref<128x128xbf16, #tpu.memory_space<vmem>>, %arg5: memref<1x128xf32, #tpu.memory_space<vmem>>, %arg6: memref<1x128xf32, #tpu.memory_space<vmem>>, %arg7: memref<128x128xbf16, #tpu.memory_space<vmem>>, %arg8: memref<1x128xf32, #tpu.memory_space<vmem>>, %arg9: memref<8x128xf32, #tpu.memory_space<vmem>>) attributes {dimension_semantics = [], scalar_prefetch = 0 : i64, scratch_operands = 0 : i64, tpu.core_type = #tpu.core_type<tc>} {
    %c0 = arith.constant 0 : index
    %c0_0 = arith.constant 0 : index
    %0 = vector.load %arg0[%c0, %c0_0] : memref<8x32xf32, #tpu.memory_space<vmem>>, vector<8x32xf32>
    %1 = arith.truncf %0 : vector<8x32xf32> to vector<8x32xbf16>
    %c0_1 = arith.constant 0 : index
    %c0_2 = arith.constant 0 : index
    %2 = vector.load %arg1[%c0_1, %c0_2] : memref<32x128xbf16, #tpu.memory_space<vmem>>, vector<32x128xbf16>
    %cst = arith.constant dense<0.000000e+00> : vector<8x128xf32>
    %3 = tpu.matmul %1, %2, %cst {dimension_numbers = #tpu.dot_dimension_numbers<[1], [0], [0], [1], [0, 0, 1, 1], [], []>} : vector<8x32xbf16>, vector<32x128xbf16>, vector<8x128xf32> -> vector<8x128xf32>
    %c0_3 = arith.constant 0 : index
    %c0_4 = arith.constant 0 : index
    %4 = vector.load %arg2[%c0_3, %c0_4] : memref<1x128xf32, #tpu.memory_space<vmem>>, vector<1x128xf32>
    %c0_5 = arith.constant 0 : index
    %c0_6 = arith.constant 0 : index
    %5 = vector.load %arg3[%c0_5, %c0_6] : memref<1x128xf32, #tpu.memory_space<vmem>>, vector<1x128xf32>
    %cst_7 = arith.constant dense<0.000000e+00> : vector<128xf32>
    %6 = vector.multi_reduction <add>, %3, %cst_7 [0] : vector<8x128xf32> to vector<128xf32>
    %7 = vector.shape_cast %6 : vector<128xf32> to vector<1x128xf32>
    %8 = arith.mulf %3, %3 : vector<8x128xf32>
    %cst_8 = arith.constant dense<0.000000e+00> : vector<128xf32>
    %9 = vector.multi_reduction <add>, %8, %cst_8 [0] : vector<8x128xf32> to vector<128xf32>
    %10 = vector.shape_cast %9 : vector<128xf32> to vector<1x128xf32>
    %cst_9 = arith.constant 1.250000e-01 : f32
    %11 = vector.broadcast %cst_9 : f32 to vector<1x128xf32>
    %12 = arith.mulf %7, %11 : vector<1x128xf32>
    %cst_10 = arith.constant 1.250000e-01 : f32
    %13 = vector.broadcast %cst_10 : f32 to vector<1x128xf32>
    %14 = arith.mulf %10, %13 : vector<1x128xf32>
    %15 = arith.mulf %12, %12 : vector<1x128xf32>
    %16 = arith.subf %14, %15 : vector<1x128xf32>
    %cst_11 = arith.constant 0.000000e+00 : f32
    %17 = vector.broadcast %cst_11 : f32 to vector<1x128xf32>
    %18 = arith.maximumf %16, %17 : vector<1x128xf32>
    %cst_12 = arith.constant 9.99999974E-6 : f32
    %19 = vector.broadcast %cst_12 : f32 to vector<1x128xf32>
    %20 = arith.addf %18, %19 : vector<1x128xf32>
    %21 = math.rsqrt %20 : vector<1x128xf32>
    %22 = arith.mulf %4, %21 : vector<1x128xf32>
    %23 = arith.mulf %12, %22 : vector<1x128xf32>
    %24 = arith.subf %5, %23 : vector<1x128xf32>
    %25 = vector.broadcast %22 : vector<1x128xf32> to vector<8x128xf32>
    %26 = arith.mulf %3, %25 : vector<8x128xf32>
    %27 = vector.broadcast %24 : vector<1x128xf32> to vector<8x128xf32>
    %28 = arith.addf %26, %27 : vector<8x128xf32>
    %cst_13 = arith.constant 0.000000e+00 : f32
    %29 = vector.broadcast %cst_13 : f32 to vector<8x128xf32>
    %30 = arith.maximumf %28, %29 : vector<8x128xf32>
    %31 = arith.truncf %30 : vector<8x128xf32> to vector<8x128xbf16>
    %c0_14 = arith.constant 0 : index
    %c0_15 = arith.constant 0 : index
    %32 = vector.load %arg4[%c0_14, %c0_15] : memref<128x128xbf16, #tpu.memory_space<vmem>>, vector<128x128xbf16>
    %cst_16 = arith.constant dense<0.000000e+00> : vector<8x128xf32>
    %33 = tpu.matmul %31, %32, %cst_16 {dimension_numbers = #tpu.dot_dimension_numbers<[1], [0], [0], [1], [0, 0, 1, 1], [], []>} : vector<8x128xbf16>, vector<128x128xbf16>, vector<8x128xf32> -> vector<8x128xf32>
    %c0_17 = arith.constant 0 : index
    %c0_18 = arith.constant 0 : index
    %34 = vector.load %arg5[%c0_17, %c0_18] : memref<1x128xf32, #tpu.memory_space<vmem>>, vector<1x128xf32>
    %c0_19 = arith.constant 0 : index
    %c0_20 = arith.constant 0 : index
    %35 = vector.load %arg6[%c0_19, %c0_20] : memref<1x128xf32, #tpu.memory_space<vmem>>, vector<1x128xf32>
    %cst_21 = arith.constant dense<0.000000e+00> : vector<128xf32>
    %36 = vector.multi_reduction <add>, %33, %cst_21 [0] : vector<8x128xf32> to vector<128xf32>
    %37 = vector.shape_cast %36 : vector<128xf32> to vector<1x128xf32>
    %38 = arith.mulf %33, %33 : vector<8x128xf32>
    %cst_22 = arith.constant dense<0.000000e+00> : vector<128xf32>
    %39 = vector.multi_reduction <add>, %38, %cst_22 [0] : vector<8x128xf32> to vector<128xf32>
    %40 = vector.shape_cast %39 : vector<128xf32> to vector<1x128xf32>
    %cst_23 = arith.constant 1.250000e-01 : f32
    %41 = vector.broadcast %cst_23 : f32 to vector<1x128xf32>
    %42 = arith.mulf %37, %41 : vector<1x128xf32>
    %cst_24 = arith.constant 1.250000e-01 : f32
    %43 = vector.broadcast %cst_24 : f32 to vector<1x128xf32>
    %44 = arith.mulf %40, %43 : vector<1x128xf32>
    %45 = arith.mulf %42, %42 : vector<1x128xf32>
    %46 = arith.subf %44, %45 : vector<1x128xf32>
    %cst_25 = arith.constant 0.000000e+00 : f32
    %47 = vector.broadcast %cst_25 : f32 to vector<1x128xf32>
    %48 = arith.maximumf %46, %47 : vector<1x128xf32>
    %cst_26 = arith.constant 9.99999974E-6 : f32
    %49 = vector.broadcast %cst_26 : f32 to vector<1x128xf32>
    %50 = arith.addf %48, %49 : vector<1x128xf32>
    %51 = math.rsqrt %50 : vector<1x128xf32>
    %52 = arith.mulf %34, %51 : vector<1x128xf32>
    %53 = arith.mulf %42, %52 : vector<1x128xf32>
    %54 = arith.subf %35, %53 : vector<1x128xf32>
    %55 = vector.broadcast %52 : vector<1x128xf32> to vector<8x128xf32>
    %56 = arith.mulf %33, %55 : vector<8x128xf32>
    %57 = vector.broadcast %54 : vector<1x128xf32> to vector<8x128xf32>
    %58 = arith.addf %56, %57 : vector<8x128xf32>
    %cst_27 = arith.constant 0.000000e+00 : f32
    %59 = vector.broadcast %cst_27 : f32 to vector<8x128xf32>
    %60 = arith.maximumf %58, %59 : vector<8x128xf32>
    %61 = arith.truncf %60 : vector<8x128xf32> to vector<8x128xbf16>
    %c0_28 = arith.constant 0 : index
    %c0_29 = arith.constant 0 : index
    %62 = vector.load %arg7[%c0_28, %c0_29] : memref<128x128xbf16, #tpu.memory_space<vmem>>, vector<128x128xbf16>
    %cst_30 = arith.constant dense<0.000000e+00> : vector<8x128xf32>
    %63 = tpu.matmul %61, %62, %cst_30 {dimension_numbers = #tpu.dot_dimension_numbers<[1], [0], [0], [1], [0, 0, 1, 1], [], []>} : vector<8x128xbf16>, vector<128x128xbf16>, vector<8x128xf32> -> vector<8x128xf32>
    %c0_31 = arith.constant 0 : index
    %c0_32 = arith.constant 0 : index
    %64 = vector.load %arg8[%c0_31, %c0_32] : memref<1x128xf32, #tpu.memory_space<vmem>>, vector<1x128xf32>
    %65 = vector.broadcast %64 : vector<1x128xf32> to vector<8x128xf32>
    %66 = arith.addf %63, %65 : vector<8x128xf32>
    %c0_33 = arith.constant 0 : index
    %c0_34 = arith.constant 0 : index
    %67 = vector.load %arg9[%c0_33, %c0_34] : memref<8x128xf32, #tpu.memory_space<vmem>>, vector<8x128xf32>
    tpu.vector_store %arg9[%c0_33, %c0_34], %66 {strides = array<i32>} : memref<8x128xf32, #tpu.memory_space<vmem>>, vector<8x128xf32>,
    return
  }
}

</mosaic_0001>

<bundles_post_ra>
// kernel: tpu_custom_call.1
= control target key start
LH: loop header
LB: loop body
LE: loop exit
PB: predicated region body
PF: predicated region fallthrough
CT: control target
= control target key end

     0   :  { %14 = vsyncpa [#allocation3], 0  ;;  %s714_s0 = inlined_call_operand.hbm [shape: f32[8,32], index: 0, kind: input, shape index: {}]   ;;  %s715_s1 = inlined_call_operand.hbm [shape: bf16[32,128], index: 1, kind: input, shape index: {}]   ;;  %s716_s2 = inlined_call_operand.vmem [shape: f32[1,128], index: 2, kind: input, shape index: {}]   ;;  %s717_s3 = inlined_call_operand.vmem [shape: f32[1,128], index: 3, kind: input, shape index: {}]   ;;  %s718_s4 = inlined_call_operand.hbm [shape: bf16[128,128], index: 4, kind: input, shape index: {}]   ;;  %s719_s5 = inlined_call_operand.vmem [shape: f32[1,128], index: 5, kind: input, shape index: {}]   ;;  %s720_s6 = inlined_call_operand.vmem [shape: f32[1,128], index: 6, kind: input, shape index: {}]   ;;  %s721_s7 = inlined_call_operand.hbm [shape: bf16[128,128], index: 7, kind: input, shape index: {}]   ;;  %s722_s8 = inlined_call_operand.vmem [shape: f32[1,128], index: 8, kind: input, shape index: {}]   ;;  %s723_s9 = inlined_call_operand.hbm [shape: f32[8,128], index: 9, kind: output, shape index: {}]  }
   0x1   :  { %15 = vsyncpa [#allocation6], 0 }
   0x2   :  { %16 = vsyncpa [#allocation9], 0  ;;  %s33_s11 = sshll.u32 %s715_s1, 4  ;;  %s34_s11 = int_to_ptr.hbm [resolvable:$true] %s33_s11 }
   0x3   :  { %17 = vsyncpa [#allocation4], 0  ;;  %s627_s12 = smov [#allocation5]   ;;  %s23_s16 = sshll.u32 %s714_s0, 4  ;;  %s24_s16 = int_to_ptr.hbm [resolvable:$true] %s23_s16 }
   0x4   :  { %s35_s13 = sshll.u32 %s627_s12, 4  ;;  %s628_s17 = smov 64   ;;  %s36_s13 = int_to_ptr.vmem [resolvable:$true] %s35_s13 }
   0x5   :  { %s629_s18 = smov 4   ;;  %s630_s19 = smov [#allocation2]  }
   0x6   :  { %41 = dma.hbm_to_vmem [thread:$0]  %s34_s11, 256, %s36_s13, [#allocation6], %s628_s17, %s628_s17, %s629_s18  }
   0x7   :  { %s25_s20 = sshll.u32 %s630_s19, 4  ;;  %s50_s23 = sshll.u32 %s718_s4, 4  ;;  %s26_s20 = int_to_ptr.vmem [resolvable:$true] %s25_s20  ;;  %s51_s23 = int_to_ptr.hbm [resolvable:$true] %s50_s23 }
   0x8   :  { %28 = dma.hbm_to_vmem [thread:$0]  %s24_s16, 128, %s26_s20, [#allocation3]  }
   0x9   :  { %s67_s25 = sshll.u32 %s721_s7, 4  ;;  %s631_s26 = smov [#allocation7]   ;;  %s68_s25 = int_to_ptr.hbm [resolvable:$true] %s67_s25 }
   0xa   :  { %s52_s27 = sshll.u32 %s631_s26, 4  ;;  %s632_s0 = smov [#allocation8]   ;;  %s53_s27 = int_to_ptr.vmem [resolvable:$true] %s52_s27 }
   0xb   :  { %58 = dma.hbm_to_vmem [thread:$0]  %s51_s23, 1024, %s53_s27, [#allocation6], %s628_s17, %s628_s17, %s629_s18  }
   0xc   :  { %s69_s28 = sshll.u32 %s632_s0, 4  ;;  %s70_s28 = int_to_ptr.vmem [resolvable:$true] %s69_s28 }
   0xd   :  { %75 = dma.hbm_to_vmem [thread:$0]  %s68_s25, 1024, %s70_s28, [#allocation9], %s628_s17, %s628_s17, %s629_s18  }
   0xe   :  { %619 = dma.done.wait [#allocation3], 128  }
   0xf   :  { %620 = vsyncadd [#allocation3], 4294967168 }
  0x10   :  { %621 = dma.done.wait [#allocation6], 1280  }
  0x11   :  { %622 = vsyncadd [#allocation6], 4294966016 }
  0x12   :  { %623 = dma.done.wait [#allocation9], 1024  }
  0x13   :  { %624 = vsyncadd [#allocation9], 4294966272  ;;  %v470_v0 = vld [vmem:[#allocation5 + $0x8] sm:$0xff]  ;;  %v469_v1 = vld [vmem:[#allocation5] sm:$0xff]  ;;  %vm113_vm0 = vcmask 261120   ;;  %s633_s13 = smov [#allocation10]  }
  0x14   :  { %123 = vmatpush.bf16.msra.mxu0 %v470_v0  ;;  %v95_v2 = vld [vmem:[#allocation2] sm:$0xff]  ;;  %v478_v4 = vld [vmem:[#allocation7 + $0x38] sm:$0xff]  ;;  %v477_v5 = vld [vmem:[#allocation7 + $0x30] sm:$0xff]  ;;  %s382_s14 = sshll.u32 %s633_s13, 4  ;;  %s384_s17 = sshll.u32 %s723_s9, 4  ;;  %s383_s14 = int_to_ptr.vmem [resolvable:$true] %s382_s14  ;;  %s385_s17 = int_to_ptr.hbm [resolvable:$true] %s384_s17 }
  0x15   :  { %v96_v3 = vpack.c.bf16 %v95_v2, %v95_v2  ;;  %238 = vmatpush.bf16.msra.mxu1 %v478_v4  ;;  %v476_v6 = vld [vmem:[#allocation7 + $0x28] sm:$0xff]  ;;  %v475_v7 = vld [vmem:[#allocation7 + $0x20] sm:$0xff]  ;;  %v474_v8 = vld [vmem:[#allocation7 + $0x18] sm:$0xff] }
  0x16   :  { %v473_v12 = vld [vmem:[#allocation7 + $0x10] sm:$0xff]  ;;  %v472_v17 = vld [vmem:[#allocation7 + $0x8] sm:$0xff]  ;;  %v471_v23 = vld [vmem:[#allocation7] sm:$0xff] }
  0x17   :  { %v130_v38 = vld [vmem:[%s716_s2] sm:$0x1]  ;;  %v486_v51 = vld [vmem:[#allocation8 + $0x38] sm:$0xff]  ;;  %v485_v52 = vld [vmem:[#allocation8 + $0x30] sm:$0xff] }
  0x18   :  { %124 = vmatpush.bf16.msra.mxu0 %v469_v1  ;;  %v131_v42 = vld [vmem:[%s717_s3] sm:$0x1]  ;;  %363 = vmatpush.bf16.msra.mxu2 %v486_v51  ;;  %v483_v54 = vld [vmem:[#allocation8 + $0x20] sm:$0xff]  ;;  %v482_v55 = vld [vmem:[#allocation8 + $0x18] sm:$0xff] }
  0x19   :  { %239 = vmatpush.bf16.msra.mxu1 %v477_v5  ;;  %v484_v53 = vld [vmem:[#allocation8 + $0x28] sm:$0xff]  ;;  %v481_v59 = vld [vmem:[#allocation8 + $0x10] sm:$0xff] }
  0x1a   :  { %v480_v0 = vld [vmem:[#allocation8 + $0x8] sm:$0xff] }
  0x1b   :  { %404 = vmatmul.msk.bf16.vlgmr.msra.gmra.mxu0 %vm113_vm0, %v96_v3 }
  0x1c   :  { %364 = vmatpush.bf16.msra.mxu2 %v485_v52 }
  0x1d   :  { %240 = vmatpush.bf16.msra.mxu1 %v476_v6  ;;  %v479_v6 = vld [vmem:[#allocation8] sm:$0xff] }
  0x20   :  { %365 = vmatpush.bf16.msra.mxu2 %v484_v53 }
  0x21   :  { %241 = vmatpush.bf16.msra.mxu1 %v475_v7 }
  0x24   :  { %366 = vmatpush.bf16.msra.mxu2 %v483_v54 }
  0x25   :  { %242 = vmatpush.bf16.msra.mxu1 %v474_v8 }
  0x28   :  { %367 = vmatpush.bf16.msra.mxu2 %v482_v55 }
  0x29   :  { %243 = vmatpush.bf16.msra.mxu1 %v473_v12 }
  0x2c   :  { %368 = vmatpush.bf16.msra.mxu2 %v481_v59 }
  0x2d   :  { %244 = vmatpush.bf16.msra.mxu1 %v472_v17 }
  0x30   :  { %369 = vmatpush.bf16.msra.mxu2 %v480_v0 }
  0x31   :  { %245 = vmatpush.bf16.msra.mxu1 %v471_v23 }
  0x34   :  { %370 = vmatpush.bf16.msra.mxu2 %v479_v6 }
  0x98   :  { %v126_v9 = vpop.f32.mrf.mxu0 }
  0x99   :  { %v132_v10 = vrot.slane %v126_v9, 4  ;;  %v138_v11 = vmul.f32 %v126_v9, %v126_v9 }
  0x9b   :  { %v133_v13 = vadd.f32 %v132_v10, %v126_v9  ;;  %v139_v14 = vrot.slane %v138_v11, 4 }
  0x9d   :  { %v134_v15 = vrot.slane %v133_v13, 2  ;;  %v140_v16 = vadd.f32 %v139_v14, %v138_v11 }
  0x9f   :  { %v135_v18 = vadd.f32 %v134_v15, %v133_v13  ;;  %v141_v19 = vrot.slane %v140_v16, 2 }
  0xa0   :  { %v128_v20 = vpop.f32.mrf.mxu0 }
  0xa1   :  { %v136_v21 = vrot.slane %v135_v18, 1  ;;  %v142_v22 = vadd.f32 %v141_v19, %v140_v16 }
  0xa3   :  { %v143_v24 = vrot.slane %v142_v22, 1  ;;  %v137_v25 = vadd.f32 %v136_v21, %v135_v18  ;;  %v251_v21 = vld [vmem:[%s719_s5] sm:$0x1] }
  0xa5   :  { %v144_v26 = vadd.f32 %v143_v24, %v142_v22  ;;  %v145_v27 = vmul.f32 0.125, %v137_v25  ;;  %v252_v25 = vld [vmem:[%s720_s6] sm:$0x1] }
  0xa7   :  { %v146_v28 = vmul.f32 0.125, %v144_v26  ;;  %v147_v29 = vmul.f32 %v145_v27, %v145_v27 }
  0xa9   :  { %v148_v30 = vsub.f32 %v146_v28, %v147_v29 }
  0xab   :  { %v149_v31 = vmax.f32 %v148_v30, 0.0 }
  0xad   :  { %v150_v32 = vadd.f32 1e-05, %v149_v31 }
  0xaf   :  { %495 = vrsqrt.f32 %v150_v32  ;;  %vm157_vm2 = vweird.f32 %v150_v32 }
  0xb5   :  { %v496_v33 = vpop.eup %495 }
  0xb6   :  { %v152_v34 = vmul.f32 %v496_v33, %v150_v32  ;;  %vm158_vm1 = vweird.f32 %v496_v33 }
  0xb7   :  { %vm159_vm3 = vmor %vm157_vm2, %vm158_vm1 }
  0xb8   :  { %v153_v35 = vmul.f32 %v496_v33, %v152_v34  ;;  %v494_v34 = vld [vmem:[%s722_s8] ss:$0 sm:$0xff] }
  0xba   :  { %v154_v36 = vmul.f32 0.5, %v153_v35 }
  0xbc   :  { %v155_v37 = vsub.f32 1.5, %v154_v36 }
  0xbe   :  { %v156_v39 = vmul.f32 %v496_v33, %v155_v37 }
  0xc0   :  { %v160_v40 = vsel %vm159_vm3, %v496_v33, %v156_v39 }
  0xc1   :  { %v161_v41 = vmul.f32 %v160_v40, %v130_v38 }
  0xc3   :  { %v162_v43 = vmul.f32 %v161_v41, %v145_v27  ;;  %v165_v44 = vperm.slane %v161_v41, 0 }
  0xc5   :  { %v163_v45 = vsub.f32 %v131_v42, %v162_v43  ;;  %v167_v46 = vmul.f32 %v165_v44, %v126_v9 }
  0xc7   :  { %v169_v47 = vperm.slane %v163_v45, 0 }
  0xc9   :  { %v171_v48 = vadd.f32 %v169_v47, %v167_v46 }
  0xcb   :  { %v172_v49 = vmax.f32 %v171_v48, 0.0 }
  0xcd   :  { %v173_v50 = vpack.c.bf16 %v172_v49, %v172_v49 }
  0xcf   :  { %246 = vmatmul.bf16.vlgmr.msra.gmra.mxu1 %v173_v50 }
 0x14c   :  { %v247_v56 = vpop.f32.mrf.mxu1 }
 0x14d   :  { %v253_v57 = vrot.slane %v247_v56, 4  ;;  %v259_v58 = vmul.f32 %v247_v56, %v247_v56 }
 0x14f   :  { %v254_v60 = vadd.f32 %v253_v57, %v247_v56  ;;  %v260_v61 = vrot.slane %v259_v58, 4 }
 0x151   :  { %v255_v62 = vrot.slane %v254_v60, 2  ;;  %v261_v63 = vadd.f32 %v260_v61, %v259_v58 }
 0x153   :  { %v256_v1 = vadd.f32 %v255_v62, %v254_v60  ;;  %v262_v2 = vrot.slane %v261_v63, 2 }
 0x154   :  { %v249_v3 = vpop.f32.mrf.mxu1 }
 0x155   :  { %v257_v4 = vrot.slane %v256_v1, 1  ;;  %v263_v5 = vadd.f32 %v262_v2, %v261_v63 }
 0x157   :  { %v264_v7 = vrot.slane %v263_v5, 1  ;;  %v258_v8 = vadd.f32 %v257_v4, %v256_v1 }
 0x159   :  { %v265_v9 = vadd.f32 %v264_v7, %v263_v5  ;;  %v266_v10 = vmul.f32 0.125, %v258_v8 }
 0x15b   :  { %v267_v11 = vmul.f32 0.125, %v265_v9  ;;  %v268_v12 = vmul.f32 %v266_v10, %v266_v10 }
 0x15d   :  { %v269_v13 = vsub.f32 %v267_v11, %v268_v12 }
 0x15f   :  { %v270_v14 = vmax.f32 %v269_v13, 0.0 }
 0x161   :  { %v271_v15 = vadd.f32 1e-05, %v270_v14 }
 0x163   :  { %497 = vrsqrt.f32 %v271_v15  ;;  %vm278_vm5 = vweird.f32 %v271_v15 }
 0x169   :  { %v498_v16 = vpop.eup %497 }
 0x16a   :  { %v273_v17 = vmul.f32 %v498_v16, %v271_v15  ;;  %vm279_vm4 = vweird.f32 %v498_v16 }
 0x16b   :  { %vm280_vm6 = vmor %vm278_vm5, %vm279_vm4 }
 0x16c   :  { %v274_v18 = vmul.f32 %v498_v16, %v273_v17 }
 0x16e   :  { %v275_v19 = vmul.f32 0.5, %v274_v18 }
 0x170   :  { %v276_v20 = vsub.f32 1.5, %v275_v19 }
 0x172   :  { %v277_v22 = vmul.f32 %v498_v16, %v276_v20 }
 0x174   :  { %v281_v23 = vsel %vm280_vm6, %v498_v16, %v277_v22 }
 0x175   :  { %v282_v24 = vmul.f32 %v281_v23, %v251_v21 }
 0x177   :  { %v283_v26 = vmul.f32 %v282_v24, %v266_v10  ;;  %v286_v27 = vperm.slane %v282_v24, 0 }
 0x179   :  { %v284_v28 = vsub.f32 %v252_v25, %v283_v26  ;;  %v288_v29 = vmul.f32 %v286_v27, %v247_v56 }
 0x17b   :  { %v290_v30 = vperm.slane %v284_v28, 0 }
 0x17d   :  { %v292_v31 = vadd.f32 %v290_v30, %v288_v29 }
 0x17f   :  { %v293_v32 = vmax.f32 %v292_v31, 0.0 }
 0x181   :  { %v294_v33 = vpack.c.bf16 %v293_v32, %v293_v32 }
 0x183   :  { %371 = vmatmul.bf16.vlgmr.msra.gmra.mxu2 %v294_v33 }
 0x206   :  { %v372_v35 = vpop.f32.mrf.mxu2 }
 0x207   :  { %v373_v36 = vadd.f32 %v494_v34, %v372_v35 }
 0x209   :  { %376 = vst [vmem:[#allocation10] sm:$0xff] %v373_v36 }
 0x20a   :  { %387 = dma.vmem_to_hbm [thread:$0]  %s383_s14, 128, %s385_s17, [#allocation4]  }
 0x20e   :  { %v374_v37 = vpop.f32.mrf.mxu2 }
 0x20f   :  { %625 = dma.done.wait [#allocation4], 128  }
 0x210   :  { %626 = vsyncadd [#allocation4], 4294967168 }
 0x211   :  { %392 = vsyncpa [#allocation3], 1 }
 0x212   :  { %393 = vsyncpa [#allocation6], 1 }
 0x213   :  { %394 = vsyncpa [#allocation9], 1 }
 0x214   :  { %395 = vsyncpa [#allocation4], 1 }

</bundles_post_ra>
